<compile_context>
chip_gen: v5e
topology: v5e:2x2
jax: 0.10.0
libtpu: 0.0.40
codegen_flags: <defaults>
</compile_context>

<pallas_src>
import jax
import jax.numpy as jnp
from jax.experimental import pallas as pl
from jax.experimental.pallas import tpu as pltpu


# ----------------------------------------------------------------------------
# Tiling plans
# ----------------------------------------------------------------------------
def _round_up(x, m):
    return (x + m - 1) // m * m


def _cdiv(a, b):
    return (a + b - 1) // b


def _plan_kn(K, N):
    """Tile / padded sizes along K and N (depend on weights only)."""
    pad_k128 = _round_up(K, 128)
    gk = _cdiv(pad_k128, 1024)                 # K tiles up to 1024 (bf16)
    tk = _round_up(_cdiv(pad_k128, gk), 128)
    pad_k = tk * gk
    pad_n128 = _round_up(N, 128)
    tn = 256 if pad_n128 >= 256 else 128       # feed the 2x256 MXU when possible
    pad_n = _round_up(N, tn)
    return tk, pad_k, tn, pad_n


def _plan_m(M):
    """Tile / padded size along M.  Keep >=2 M-tiles whenever possible so the
    'parallel' axis can be sharded across both v7x TensorCores."""
    pad_m16 = _round_up(M, 16)
    if pad_m16 > 512:
        tm = 256
    elif pad_m16 >= 32:
        tm = _round_up(pad_m16 // 2, 16)
    else:
        tm = pad_m16
    pad_m = _round_up(M, tm)
    return tm, pad_m


# ----------------------------------------------------------------------------
# Fused GEMM + BN-affine + (residual) + Hardtanh Pallas kernel
# ----------------------------------------------------------------------------
def _make_gemm_kernel(has_scale, has_residual, hardtanh):
    def kernel(*refs):
        it = iter(refs)
        a_ref = next(it)
        b_ref = next(it)
        sc_ref = next(it) if has_scale else None
        sh_ref = next(it)
        r_ref = next(it) if has_residual else None
        o_ref = next(it)
        acc_ref = next(it)

        k = pl.program_id(2)

        @pl.when(k == 0)
        def _():
            acc_ref[...] = jnp.zeros_like(acc_ref)

        acc_ref[...] += jnp.dot(a_ref[...], b_ref[...],
                                preferred_element_type=jnp.float32)

        @pl.when(k == pl.num_programs(2) - 1)
        def _():
            y = acc_ref[...]
            if has_scale:
                y = y * sc_ref[...]
            y = y + sh_ref[...]
            if has_residual:
                y = y + r_ref[...].astype(jnp.float32)
            if hardtanh:
                y = jnp.clip(y, -1.0, 1.0)
            o_ref[...] = y.astype(o_ref.dtype)

    return kernel


def fused_gemm(a, prep, residual=None, hardtanh=False, out_dtype=jnp.bfloat16):
    """out = clip?( (a @ B) * scale? + shift + residual? , -1, 1 )

    a: (M, K) activations; B/scale/shift come pre-padded (bf16 / f32) in `prep`.
    """
    K, N = prep["K"], prep["N"]
    M = a.shape[0]
    assert a.shape[1] == K

    tk, pad_k, tn, pad_n = _plan_kn(K, N)
    tm, pad_m = _plan_m(M)

    a_p = jnp.pad(a.astype(jnp.bfloat16), ((0, pad_m - M), (0, pad_k - K)))
    b_p = prep["b"]            # (pad_k, pad_n) bf16, padded once at prep time
    sh_p = prep["shift"]       # (1, pad_n) f32
    sc_p = prep["scale"]       # (1, pad_n) f32 or None (folded into B)
    has_scale = sc_p is not None
    has_residual = residual is not None

    inputs = [a_p, b_p]
    in_specs = [
        pl.BlockSpec((tm, tk), lambda i, j, k: (i, k)),
        pl.BlockSpec((tk, tn), lambda i, j, k: (k, j)),
    ]
    if has_scale:
        inputs.append(sc_p)
        in_specs.append(pl.BlockSpec((1, tn), lambda i, j, k: (0, j)))
    inputs.append(sh_p)
    in_specs.append(pl.BlockSpec((1, tn), lambda i, j, k: (0, j)))
    if has_residual:
        r_p = jnp.pad(residual.astype(jnp.bfloat16),
                      ((0, pad_m - M), (0, pad_n - N)))
        inputs.append(r_p)
        in_specs.append(pl.BlockSpec((tm, tn), lambda i, j, k: (i, j)))

    grid = (pad_m // tm, pad_n // tn, pad_k // tk)

    out = pl.pallas_call(
        _make_gemm_kernel(has_scale, has_residual, hardtanh),
        out_shape=jax.ShapeDtypeStruct((pad_m, pad_n), out_dtype),
        grid_spec=pltpu.PrefetchScalarGridSpec(
            num_scalar_prefetch=0,
            grid=grid,
            in_specs=in_specs,
            out_specs=pl.BlockSpec((tm, tn), lambda i, j, k: (i, j)),
            scratch_shapes=[pltpu.VMEM((tm, tn), jnp.float32)],
        ),
        compiler_params=pltpu.CompilerParams(
            dimension_semantics=("parallel", "parallel", "arbitrary")),
    )(*inputs)

    return out[:M, :N]


# ----------------------------------------------------------------------------
# Conv (GEMM lowering) + pooling
# ----------------------------------------------------------------------------
def conv2d_fused(x, prep, stride, padding, residual=None, hardtanh=False,
                 out_dtype=jnp.bfloat16):
    """x: (N, H, W, Cin) NHWC; conv weights/BN live in `prep` (pre-padded)."""
    N, H, W, Cin = x.shape
    KH, KW, Cout = prep["KH"], prep["KW"], prep["Cout"]
    Ho = (H + 2 * padding - KH) // stride + 1
    Wo = (W + 2 * padding - KW) // stride + 1

    xb = x.astype(jnp.bfloat16)
    if KH == 1 and KW == 1 and padding == 0:
        # 1x1 fast path: no im2col materialization, just a (strided) reshape.
        if stride > 1:
            xb = xb[:, ::stride, ::stride, :]
        a = xb.reshape(N * Ho * Wo, Cin)
    else:
        # TODO(synk): KxK im2col still materialized (in bf16) via XLA glue; a
        # fully in-kernel shifted-window read would remove this HBM round trip.
        xp = jnp.pad(xb, ((0, 0), (padding, padding), (padding, padding), (0, 0)))
        patches = []
        for kh in range(KH):
            for kw in range(KW):
                patches.append(
                    xp[:, kh:kh + stride * Ho:stride, kw:kw + stride * Wo:stride, :])
        # order (kh, kw, cin) matches w.reshape(KH*KW*Cin, Cout)
        a = jnp.stack(patches, axis=3).reshape(N * Ho * Wo, KH * KW * Cin)

    res2d = None
    if residual is not None:
        res2d = residual.reshape(N * Ho * Wo, Cout)

    out = fused_gemm(a, prep, residual=res2d, hardtanh=hardtanh,
                     out_dtype=out_dtype)
    return out.reshape(N, Ho, Wo, Cout)


def maxpool_3x3_s2(x):
    # MaxPool2d(3, stride=2, padding=1) -- padding behaves like -inf.
    # TODO(synk): pooling kept in lax glue (negligible vs conv GEMMs).
    init = jnp.array(-jnp.inf, dtype=x.dtype)
    return jax.lax.reduce_window(
        x, init, jax.lax.max,
        window_dimensions=(1, 3, 3, 1),
        window_strides=(1, 2, 2, 1),
        padding=[(0, 0), (1, 1), (1, 1), (0, 0)])


# ----------------------------------------------------------------------------
# One-time weight preprocessing (binarize, BN fold, pad, bf16)
# ----------------------------------------------------------------------------
def _prep_conv(w, bn, *, xnor, eps=1e-5):
    """w: (KH, KW, Cin, Cout); bn: (gamma, beta, mean, var)."""
    gamma, beta, mean, var = bn
    bn_scale = gamma / jnp.sqrt(var + eps)
    shift = (beta - mean * bn_scale)[None, :]
    KH, KW, Cin, Cout = w.shape

    if xnor:
        # XNORConv2d: sign(w) * mean(|w|) per output channel.  Keep B exactly
        # +-1 in bf16; fold alpha into the f32 epilogue scale.
        alpha = jnp.mean(jnp.abs(w), axis=(0, 1, 2))
        b = jnp.sign(w).reshape(KH * KW * Cin, Cout)
        scale = (alpha * bn_scale)[None, :]
    else:
        # Real conv: fold BN scale straight into the weights, drop scale input.
        b = (w * bn_scale[None, None, None, :]).reshape(KH * KW * Cin, Cout)
        scale = None

    K, N = b.shape
    tk, pad_k, tn, pad_n = _plan_kn(K, N)
    b_p = jnp.pad(b, ((0, pad_k - K), (0, pad_n - N))).astype(jnp.bfloat16)
    sh_p = jnp.pad(shift, ((0, 0), (0, pad_n - N))).astype(jnp.float32)
    sc_p = (None if scale is None
            else jnp.pad(scale, ((0, 0), (0, pad_n - N))).astype(jnp.float32))
    return dict(b=b_p, scale=sc_p, shift=sh_p, K=K, N=N,
                KH=KH, KW=KW, Cout=Cout)


def prepare_inference_params(params):
    prep = {"conv1": _prep_conv(params["conv1"], params["bn1"], xnor=False)}
    layers = []
    for blocks in params["layers"]:
        pblocks = []
        for blk in blocks:
            pb = {"stride": blk["stride"],
                  "conv1": _prep_conv(blk["conv1"], blk["bn1"], xnor=True),
                  "conv2": _prep_conv(blk["conv2"], blk["bn2"], xnor=True),
                  "conv3": _prep_conv(blk["conv3"], blk["bn3"], xnor=True)}
            if "ds_conv" in blk:
                # downsample conv is the *real* (non-XNOR) pretrained conv
                pb["ds"] = _prep_conv(blk["ds_conv"], blk["ds_bn"], xnor=False)
            pblocks.append(pb)
        layers.append(pblocks)
    prep["layers"] = layers
    prep["hash_w"] = params["hash_w"].astype(jnp.float32)
    prep["hash_b"] = params["hash_b"].astype(jnp.float32)
    return prep


# ----------------------------------------------------------------------------
# Parameter construction (deterministic, synthetic)
# ----------------------------------------------------------------------------
def _init_conv(key, kh, kw, cin, cout):
    return jax.random.normal(key, (kh, kw, cin, cout), jnp.float32) * 0.05


def _init_bn(key, c):
    k1, k2, k3, k4 = jax.random.split(key, 4)
    gamma = jax.random.uniform(k1, (c,), jnp.float32, 0.5, 1.5)
    beta = jax.random.normal(k2, (c,), jnp.float32) * 0.1
    mean = jax.random.normal(k3, (c,), jnp.float32) * 0.1
    var = jax.random.uniform(k4, (c,), jnp.float32, 0.5, 1.5)
    return gamma, beta, mean, var


def build_params(key, width=16, num_layer=(1, 1, 1, 1),
                 input_channels=3, hash_bit=64, expansion=4):
    keys = iter(jax.random.split(key, 1024))
    params = {"conv1": _init_conv(next(keys), 7, 7, input_channels, width),
              "bn1": _init_bn(next(keys), width)}

    in_c = width
    widths = [width, width * 2, width * 4, width * 8]
    layers = []
    for li, (w_out, n_blocks) in enumerate(zip(widths, num_layer)):
        layer_stride = 1 if li == 0 else 2
        blocks = []
        for bi in range(n_blocks):
            s = layer_stride if bi == 0 else 1
            blk = {"stride": s,
                   "conv1": _init_conv(next(keys), 1, 1, in_c, w_out),
                   "bn1": _init_bn(next(keys), w_out),
                   "conv2": _init_conv(next(keys), 3, 3, w_out, w_out),
                   "bn2": _init_bn(next(keys), w_out),
                   "conv3": _init_conv(next(keys), 1, 1, w_out, w_out * expansion),
                   "bn3": _init_bn(next(keys), w_out * expansion)}
            if s != 1 or in_c != w_out * expansion:
                blk["ds_conv"] = _init_conv(next(keys), 1, 1, in_c,
                                            w_out * expansion)
                blk["ds_bn"] = _init_bn(next(keys), w_out * expansion)
            blocks.append(blk)
            in_c = w_out * expansion
        layers.append(blocks)
    params["layers"] = layers
    params["hash_w"] = jax.random.normal(next(keys), (in_c, hash_bit),
                                         jnp.float32) * 0.02
    params["hash_b"] = jax.random.normal(next(keys), (hash_bit,),
                                         jnp.float32) * 0.01
    return params


# ----------------------------------------------------------------------------
# Forward pass
# ----------------------------------------------------------------------------
def bottleneck_forward(x, pb):
    residual = x
    stride = pb["stride"]
    y = conv2d_fused(x, pb["conv1"], 1, 0, hardtanh=True)
    y = conv2d_fused(y, pb["conv2"], stride, 1, hardtanh=True)
    if "ds" in pb:
        residual = conv2d_fused(x, pb["ds"], stride, 0, hardtanh=False)
    # conv3 -> bn3 -> (+residual) -> hardtanh, all fused in the GEMM epilogue
    y = conv2d_fused(y, pb["conv3"], 1, 0, residual=residual, hardtanh=True)
    return y


def resnet_xnor_forward(prep, x_nchw):
    # layout: accept NCHW (PyTorch) -> NHWC internally
    x = jnp.transpose(x_nchw.astype(jnp.float32), (0, 2, 3, 1))

    x = conv2d_fused(x, prep["conv1"], stride=2, padding=3, hardtanh=True)
    x = maxpool_3x3_s2(x)

    for blocks in prep["layers"]:
        for blk in blocks:
            x = bottleneck_forward(x, blk)

    # AvgPool2d(kernel = remaining spatial, stride=1) -> (N, C)
    x = jnp.mean(x.astype(jnp.float32), axis=(1, 2))

    # hash_layer: tiny (batch x 512 x 64) GEMM -> plain XLA dot (Pallas call
    # overhead would dwarf the ~0.1 MFLOP of useful work).
    out = jnp.dot(x, prep["hash_w"]) + prep["hash_b"][None, :]
    return out


# ----------------------------------------------------------------------------
if __name__ == "__main__":
    key = jax.random.PRNGKey(0)
    k_param, k_input = jax.random.split(key)

    # Small, structurally faithful instantiation.
    width = 16
    num_layer = (1, 1, 1, 1)
    hash_bit = 64
    params = build_params(k_param, width=width, num_layer=num_layer,
                          input_channels=3, hash_bit=hash_bit)
    prep = prepare_inference_params(params)   # one-time weight preprocessing

    x = jax.random.normal(k_input, (2, 3, 64, 64), jnp.float32)  # NCHW input

    out = resnet_xnor_forward(prep, x)
    out = jax.block_until_ready(out)
    assert out.shape == (2, hash_bit)
    assert jnp.all(jnp.isfinite(out))
    print("KERNEL_OK")
</pallas_src>

<mosaic_0001>
module attributes {stable_mosaic.version = 11 : i64} {
  func.func @kernel(%arg0: i32, %arg1: i32, %arg2: i32, %arg3: memref<256x256xbf16, #tpu.memory_space<vmem>>, %arg4: memref<256x128xbf16, #tpu.memory_space<vmem>>, %arg5: memref<1x128xf32, #tpu.memory_space<vmem>>, %arg6: memref<256x128xbf16, #tpu.memory_space<vmem>>, %arg7: memref<256x128xf32, #tpu.memory_space<vmem>>) attributes {dimension_semantics = [#tpu.dimension_semantics<parallel>, #tpu.dimension_semantics<parallel>, #tpu.dimension_semantics<arbitrary>], iteration_bounds = array<i64: 8, 1, 1>, scalar_prefetch = 0 : i64, scratch_operands = 1 : i64, tpu.core_type = #tpu.core_type<tc>, window_params = [{transform_indices = @transform_0, window_bounds = array<i64: 256, 256>}, {transform_indices = @transform_1, window_bounds = array<i64: 256, 128>}, {transform_indices = @transform_2, window_bounds = array<i64: 1, 128>}, {transform_indices = @transform_3, window_bounds = array<i64: 256, 128>}]} {
    %c0_i32 = arith.constant 0 : i32
    %0 = arith.cmpi eq, %arg2, %c0_i32 : i32
    %1 = arith.extui %0 : i1 to i32
    %c0_i32_0 = arith.constant 0 : i32
    %2 = arith.cmpi ne, %1, %c0_i32_0 : i32
    scf.if %2 {
      %cst_10 = arith.constant 0.000000e+00 : f32
      %12 = vector.broadcast %cst_10 : f32 to vector<256x128xf32>
      %c0_11 = arith.constant 0 : index
      %c0_12 = arith.constant 0 : index
      %13 = vector.load %arg7[%c0_11, %c0_12] : memref<256x128xf32, #tpu.memory_space<vmem>>, vector<256x128xf32>
      tpu.vector_store %arg7[%c0_11, %c0_12], %12 {strides = array<i32>} : memref<256x128xf32, #tpu.memory_space<vmem>>, vector<256x128xf32>,
    } else {
    }
    %c0 = arith.constant 0 : index
    %c0_1 = arith.constant 0 : index
    %3 = vector.load %arg7[%c0, %c0_1] : memref<256x128xf32, #tpu.memory_space<vmem>>, vector<256x128xf32>
    %c0_2 = arith.constant 0 : index
    %c0_3 = arith.constant 0 : index
    %4 = vector.load %arg3[%c0_2, %c0_3] : memref<256x256xbf16, #tpu.memory_space<vmem>>, vector<256x256xbf16>
    %c0_4 = arith.constant 0 : index
    %c0_5 = arith.constant 0 : index
    %5 = vector.load %arg4[%c0_4, %c0_5] : memref<256x128xbf16, #tpu.memory_space<vmem>>, vector<256x128xbf16>
    %cst = arith.constant dense<0.000000e+00> : vector<256x128xf32>
    %6 = tpu.matmul %4, %5, %cst {dimension_numbers = #tpu.dot_dimension_numbers<[1], [0], [0], [1], [0, 0, 1, 1], [], []>} : vector<256x256xbf16>, vector<256x128xbf16>, vector<256x128xf32> -> vector<256x128xf32>
    %7 = arith.addf %3, %6 : vector<256x128xf32>
    %c0_6 = arith.constant 0 : index
    %c0_7 = arith.constant 0 : index
    %8 = vector.load %arg7[%c0_6, %c0_7] : memref<256x128xf32, #tpu.memory_space<vmem>>, vector<256x128xf32>
    tpu.vector_store %arg7[%c0_6, %c0_7], %7 {strides = array<i32>} : memref<256x128xf32, #tpu.memory_space<vmem>>, vector<256x128xf32>,
    %c0_i32_8 = arith.constant 0 : i32
    %9 = arith.cmpi eq, %arg2, %c0_i32_8 : i32
    %10 = arith.extui %9 : i1 to i32
    %c0_i32_9 = arith.constant 0 : i32
    %11 = arith.cmpi ne, %10, %c0_i32_9 : i32
    scf.if %11 {
      %c0_10 = arith.constant 0 : index
      %c0_11 = arith.constant 0 : index
      %12 = vector.load %arg7[%c0_10, %c0_11] : memref<256x128xf32, #tpu.memory_space<vmem>>, vector<256x128xf32>
      %c0_12 = arith.constant 0 : index
      %c0_13 = arith.constant 0 : index
      %13 = vector.load %arg5[%c0_12, %c0_13] : memref<1x128xf32, #tpu.memory_space<vmem>>, vector<1x128xf32>
      %14 = vector.broadcast %13 : vector<1x128xf32> to vector<256x128xf32>
      %15 = arith.addf %12, %14 : vector<256x128xf32>
      %cst_14 = arith.constant -1.000000e+00 : f32
      %cst_15 = arith.constant 1.000000e+00 : f32
      %16 = vector.broadcast %cst_14 : f32 to vector<256x128xf32>
      %17 = arith.maximumf %16, %15 : vector<256x128xf32>
      %18 = vector.broadcast %cst_15 : f32 to vector<256x128xf32>
      %19 = arith.minimumf %18, %17 : vector<256x128xf32>
      %20 = arith.truncf %19 : vector<256x128xf32> to vector<256x128xbf16>
      %c0_16 = arith.constant 0 : index
      %c0_17 = arith.constant 0 : index
      %21 = vector.load %arg6[%c0_16, %c0_17] : memref<256x128xbf16, #tpu.memory_space<vmem>>, vector<256x128xbf16>
      tpu.vector_store %arg6[%c0_16, %c0_17], %20 {strides = array<i32>} : memref<256x128xbf16, #tpu.memory_space<vmem>>, vector<256x128xbf16>,
    } else {
    }
    return
  }
  func.func @transform_0(%arg0: i32, %arg1: i32, %arg2: i32) -> (i32, i32) {
    %c0_i32 = arith.constant 0 : i32
    return %arg0, %arg2 : i32, i32
  }
  func.func @transform_1(%arg0: i32, %arg1: i32, %arg2: i32) -> (i32, i32) {
    %c0_i32 = arith.constant 0 : i32
    return %arg2, %arg1 : i32, i32
  }
  func.func @transform_2(%arg0: i32, %arg1: i32, %arg2: i32) -> (i32, i32) {
    %c0_i32 = arith.constant 0 : i32
    %c0_i32_0 = arith.constant 0 : i32
    return %c0_i32, %arg1 : i32, i32
  }
  func.func @transform_3(%arg0: i32, %arg1: i32, %arg2: i32) -> (i32, i32) {
    %c0_i32 = arith.constant 0 : i32
    return %arg0, %arg1 : i32, i32
  }
}

</mosaic_0001>

<bundles_post_ra>
// kernel: tpu_custom_call.1
= control target key start
LH: loop header
LB: loop body
LE: loop exit
PB: predicated region body
PF: predicated region fallthrough
CT: control target
= control target key end

     0   :  { %s2154_s0 = inlined_call_operand.hbm [shape: bf16[2048,256], index: 0, kind: input, shape index: {}]   ;;  %s2155_s1 = inlined_call_operand.hbm [shape: bf16[256,128], index: 1, kind: input, shape index: {}]   ;;  %s2156_s2 = inlined_call_operand.vmem [shape: f32[1,128], index: 2, kind: input, shape index: {}]   ;;  %s2157_s3 = inlined_call_operand.hbm [shape: bf16[2048,128], index: 3, kind: output, shape index: {}]  }
   0x1   :  { %2158 = sst [smem:[#allocation12_spill]] %s2155_s1 }
   0x2   :  { %8 = vsyncpa [#allocation4], 0 }
   0x3   :  { %10 = vsyncpa [#allocation4 + $0x1], 0 }
   0x4   :  { %11 = vsyncpa [#allocation7], 0 }
   0x5   :  { %12 = vsyncpa [#allocation5], 0 }
   0x6   :  { %14 = vsyncpa [#allocation5 + $0x1], 0  ;;  %s1884_s12 = smov 0   ;;  %s1886_s13 = smov 0  }
   0x7   :  { %s1888_s14 = smov 0   ;;  %s1890_s15 = smov 0  }
   0x8   :  { %s1892_s16 = smov 0   ;;  %s1894_s17 = smov 0  }
   0x9 LB: > { %s1224_s18 = sadd.s32 4294967295, %s1855_s17   ;;  %s1225_s19 = sadd.s32 4294967294, %s1855_s17   ;;  %s1855_s17 = sphi %s1894_s17, %s20_s17   ;;  %s1851_s16 = sphi %s1892_s16, %s2171_s16   ;;  %s1847_s15 = sphi %s1890_s15, %s2170_s15   ;;  %s1843_s14 = sphi %s1888_s14, %s2169_s14   ;;  %s1839_s13 = sphi %s1886_s13, %s2168_s13   ;;  %s1835_s12 = sphi %s1884_s12, %s2167_s12  }
   0xa   : > { %p61_p0 = scmp.ne.s32.totalorder %s1839_s13, %s1835_s12  ;;  %p1918_p1 = scmp.eq.s32.totalorder %s1224_s18, 0 }
   0xb   : > { %p1922_p2 = scmp.eq.s32.totalorder %s1224_s18, 7  ;;  %p147_p3 = scmp.eq.s32.totalorder %s1225_s19, 7 }
   0xc   : > { %p1928_p4 = por %p1918_p1, %p61_p0  ;;  %p1226_p5 = scmp.ge.s32.totalorder %s1855_s17, 1 }
   0xd   : > { %p1933_p6 = por %p147_p3, %p61_p0  ;;  %p154_p7 = scmp.lt.s32.totalorder %s1855_s17, 9 }
   0xe   : > { %s2163_s1 = sld [smem:[#allocation12_spill]]  ;;  %s1857_s28 = smov [#allocation6]  }
   0xf   : > { %p1941_p8 = pnand %p1226_p5, %p154_p7  ;;  %s171_s29 = sshll.u32 %s1857_s28, 4  ;;  %s172_s29 = int_to_ptr.vmem [resolvable:$true] %s171_s29 }
  0x10   : > { %s1858_s30 = smov 64   ;;  %s1859_s4 = smov 4  }
  0x11   : > { %p1637_p9 = pneg %p1941_p8  ;;  %s39_s5 = sadd.s32 1, %s1851_s16 }
  0x12   : > { %p41_p11 = scmp.ge.s32.totalorder %s39_s5, 8  ;;  %s48_s6 = sadd.s32 1, %s1843_s14 }
  0x13   : > { %p1638_p10 = pnand %p1637_p9, %p1918_p1  ;;  %p55_p12 = scmp.ne.s32.totalorder %s1843_s14, %s1839_s13 }
  0x14   : > { %s169_s26 = sshll.u32 %s2163_s1, 4  ;;  %p56_p13 = scmp.eq.s32.totalorder %s1855_s17, 0  ;;  %s170_s26 = int_to_ptr.hbm [resolvable:$true] %s169_s26 }
  0x15   : > { %1640 = dma.hbm_to_vmem [thread:$0]  (!%p1638_p10), %s170_s26, 2048, %s172_s29, [#allocation7], %s1858_s30, %s1858_s30, %s1859_s4  }
  0x16   : > { %s2173_s5 = smov (%p41_p11, %s39_s5), 0  ;;  %p1956_p0 = por %p56_p13, %p55_p12 }
  0x17   : > { %p1962_p3 = por %p1922_p2, %p55_p12  ;;  %s43_s9 = ssub.s32 %s1851_s16, %s2173_s5 }
  0x18   : > { %p1650_p5 = scmp.lt.s32.totalorder %s1855_s17, 8  ;;  %p46_p7 = scmp.eq.s32.totalorder %s43_s9, 0 }
  0x19   : > { %s191_s10 = sand.u32 1, %s1843_s14   ;;  %s1468_s19 = sshll.u32 %s1851_s16, 8 }
  0x1a   : > { %s1230_s11 = sshll.u32 %s191_s10, 8  ;;  %s203_s26 = scalar_lea.hbm %s2154_s0, %s1468_s19 }
  0x1b   : > { %s1971_s18 = scalar_select %p46_p7, %s1843_s14, %s48_s6  }
  0x1c   : > { %s195_s28 = scalar_lea.vmem [#allocation3], %s1230_s11  ;;  %s204_s21 = sshll.u32 %s203_s26, 4  ;;  %s205_s21 = int_to_ptr.hbm [resolvable:$true] %s204_s21 }
  0x1d   : > { %s206_s29 = sshll.u32 %s195_s28, 4  ;;  %p1642_p2 = pnand %p1650_p5, %p1956_p0  ;;  %s207_s29 = int_to_ptr.vmem [resolvable:$true] %s206_s29 }
  0x1e   : > { %s192_s30 = scalar_lea.sflag [#allocation4], %s191_s10  ;;  %s1860_s4 = smov 128  }
  0x1f   : > { %s1861_s1 = smov 8   ;;  %218 = sbr.rel (%p1941_p8) target bundleno = 336 (0x150), region = 32 }
  0x20   : > { %1644 = dma.hbm_to_vmem [thread:$0]  (!%p1642_p2), %s205_s21, 4096, %s207_s29, %s192_s30, %s1860_s4, %s1860_s4, %s1861_s1  }
  0x21   : > { %s1982_s6 = sand.u32 (!%p1941_p8), 1, %s1839_s13  }
  0x22   : > { %s1235_s9 = sshll.u32 (!%p1941_p8), %s1982_s6, 8  ;;  %s221_s11 = scalar_lea.sflag (!%p1941_p8), [#allocation4], %s1982_s6 }
  0x23   : > { %s1986_s19 = scalar_lea.vmem (!%p1941_p8), [#allocation3], %s1235_s9 }
  0x24   : > { %1822 = dma.done.wait (%p1928_p4), %s221_s11, 4096  }
  0x25   : > { %1824 = vsyncadd (%p1928_p4), %s221_s11, 4294963200 }
  0x26   : > { %1826 = dma.done.wait (%p1918_p1), [#allocation7], 2048  }
  0x27   : > { %1828 = vsyncadd (%p1918_p1), [#allocation7], 4294965248  ;;  %v1508_v0 = vld [vmem:[#allocation6 + $0x38] sm:$0xff]  ;;  %v1507_v2 = vld [vmem:[#allocation6 + $0x30] sm:$0xff]  ;;  %s1237_s22 = sshll.u32 %s1982_s6, 7  ;;  %s1517_s7 = sshll.u32 %s1847_s15, 7 }
  0x28   : > { %v1516_v1 = vld [vmem:[#allocation6 + $0x78] sm:$0xff]  ;;  %651 = vmatpush.bf16.msra.mxu0 %v1508_v0  ;;  %1613 = vmatpush.bf16.msra.mxu2 %v1508_v0  ;;  %v1515_v3 = vld [vmem:[#allocation6 + $0x70] sm:$0xff]  ;;  %v1506_v4 = vld [vmem:[#allocation6 + $0x28] sm:$0xff]  ;;  %s2069_s27 = scalar_lea.vmem [#allocation8], %s1237_s22  ;;  %s1105_s25 = scalar_lea.hbm %s2157_s3, %s1517_s7 }
  0x29   : > { %740 = vmatpush.bf16.msra.mxu1 %v1516_v1  ;;  %1621 = vmatpush.bf16.msra.mxu3 %v1516_v1  ;;  %v1514_v5 = vld [vmem:[#allocation6 + $0x68] sm:$0xff]  ;;  %v1505_v6 = vld [vmem:[#allocation6 + $0x20] sm:$0xff]  ;;  %v1504_v8 = vld [vmem:[#allocation6 + $0x18] sm:$0xff]  ;;  %s1106_s26 = sshll.u32 %s2069_s27, 4  ;;  %s1108_s15 = sshll.u32 %s1105_s25, 4  ;;  %s1107_s26 = int_to_ptr.vmem [resolvable:$true] %s1106_s26  ;;  %s1109_s15 = int_to_ptr.hbm [resolvable:$true] %s1108_s15 }
  0x2a   : > { %v1513_v7 = vld [vmem:[#allocation6 + $0x60] sm:$0xff]  ;;  %v1512_v9 = vld [vmem:[#allocation6 + $0x58] sm:$0xff]  ;;  %v1503_v10 = vld [vmem:[#allocation6 + $0x10] sm:$0xff]  ;;  %s1093_s28 = scalar_lea.sflag [#allocation5], %s1982_s6  ;;  %s1783_s29 = sshra.s32 %s1109_s15, 4  ;;  %s1784_s29 = int_to_ptr.hbm [resolvable:$true] %s1783_s29 }
  0x2b   : > { %v1511_v11 = vld [vmem:[#allocation6 + $0x50] sm:$0xff]  ;;  %v1502_v12 = vld [vmem:[#allocation6 + $0x8] sm:$0xff]  ;;  %v1501_v14 = vld [vmem:[#allocation6] sm:$0xff]  ;;  %s1785_s21 = scalar_lea.hbm %s1784_s29, 128  ;;  %s1789_s9 = scalar_lea.hbm %s2157_s3, 1024 }
  0x2c   : > { %652 = vmatpush.bf16.msra.mxu0 %v1507_v2  ;;  %1614 = vmatpush.bf16.msra.mxu2 %v1507_v2  ;;  %v1510_v13 = vld [vmem:[#allocation6 + $0x48] sm:$0xff]  ;;  %v1509_v15 = vld [vmem:[#allocation6 + $0x40] sm:$0xff]  ;;  %v1248_v28 = vld [vmem:[%s1986_s19 + $0x10] sm:$0xf]  ;;  %p1786_p1 = scmp.ne.s32.totalorder %s1784_s29, %s1785_s21  ;;  %p1790_p9 = scmp.lt.s32.totalorder %s1784_s29, %s2157_s3 }
  0x2d   : > { %741 = vmatpush.bf16.msra.mxu1 %v1515_v3  ;;  %1622 = vmatpush.bf16.msra.mxu3 %v1515_v3  ;;  %v1240_v16 = vld [vmem:[%s1986_s19] sm:$0xf]  ;;  %v1470_v17 = vld [vmem:[%s1986_s19 + $0x4] sm:$0xf0]  ;;  %v1469_v20 = vld [vmem:[%s1986_s19 + $0x4] sm:$0xf]  ;;  %p1791_p10 = scmp.lt.s32.totalorder %s1789_s9, %s1785_s21 }
  0x2e   : > { %v1304_v18 = vld [vmem:[%s1986_s19 + $0x80] sm:$0xf]  ;;  %v1486_v19 = vld [vmem:[%s1986_s19 + $0x84] sm:$0xf0]  ;;  %v1242_v21 = vld [vmem:[%s1986_s19 + $0x8] sm:$0xf0]  ;;  %v1241_v24 = vor.u32 %v1470_v17, %v1240_v16  ;;  %p1787_p4 = pnand %p1786_p1, %p1962_p3 }
  0x2f   : > { %v1485_v22 = vld [vmem:[%s1986_s19 + $0x84] sm:$0xf]  ;;  %v1306_v23 = vld [vmem:[%s1986_s19 + $0x88] sm:$0xf0]  ;;  %v1305_v25 = vor.u32 %v1486_v19, %v1304_v18  ;;  %v1245_v26 = vor.u32 %v1469_v20, %v1242_v21  ;;  %v1472_v29 = vld [vmem:[%s1986_s19 + $0x14] sm:$0xf0]  ;;  %p1792_p11 = por %p1791_p10, %p1790_p9 }
  0x30   : > { %653 = vmatpush.bf16.msra.mxu0 %v1506_v4  ;;  %1615 = vmatpush.bf16.msra.mxu2 %v1506_v4  ;;  %v1309_v27 = vor.u32 %v1485_v22, %v1306_v23  ;;  %v1312_v30 = vld [vmem:[%s1986_s19 + $0x90] sm:$0xf]  ;;  %v1488_v31 = vld [vmem:[%s1986_s19 + $0x94] sm:$0xf0]  ;;  %v1471_v32 = vld [vmem:[%s1986_s19 + $0x14] sm:$0xf]  ;;  %v1249_v36 = vor.u32 %v1472_v29, %v1248_v28  ;;  %p1788_p8 = pneg %p1787_p4 }
  0x31   : > { %742 = vmatpush.bf16.msra.mxu1 %v1514_v5  ;;  %1623 = vmatpush.bf16.msra.mxu3 %v1514_v5  ;;  %v1250_v33 = vld [vmem:[%s1986_s19 + $0x18] sm:$0xf0]  ;;  %v1487_v34 = vld [vmem:[%s1986_s19 + $0x94] sm:$0xf]  ;;  %v1313_v37 = vor.u32 %v1488_v31, %v1312_v30  ;;  %v1256_v40 = vld [vmem:[%s1986_s19 + $0x20] sm:$0xf] }
  0x32   : > { %v1314_v35 = vld [vmem:[%s1986_s19 + $0x98] sm:$0xf0]  ;;  %v1253_v38 = vor.u32 %v1471_v32, %v1250_v33  ;;  %v1474_v41 = vld [vmem:[%s1986_s19 + $0x24] sm:$0xf0]  ;;  %v1320_v42 = vld [vmem:[%s1986_s19 + $0xa0] sm:$0xf]  ;;  %p1793_p12 = pnand %p1792_p11, %p1788_p8 }
  0x33   : > { %v1317_v39 = vor.u32 %v1487_v34, %v1314_v35  ;;  %v1490_v43 = vld [vmem:[%s1986_s19 + $0xa4] sm:$0xf0]  ;;  %v1473_v44 = vld [vmem:[%s1986_s19 + $0x24] sm:$0xf]  ;;  %v1258_v45 = vld [vmem:[%s1986_s19 + $0x28] sm:$0xf0]  ;;  %v1257_v48 = vor.u32 %v1474_v41, %v1256_v40 }
  0x34   : > { %654 = vmatpush.bf16.msra.mxu0 %v1505_v6  ;;  %1616 = vmatpush.bf16.msra.mxu2 %v1505_v6  ;;  %v1489_v46 = vld [vmem:[%s1986_s19 + $0xa4] sm:$0xf]  ;;  %v1322_v47 = vld [vmem:[%s1986_s19 + $0xa8] sm:$0xf0]  ;;  %v1321_v49 = vor.u32 %v1490_v43, %v1320_v42  ;;  %v1261_v50 = vor.u32 %v1473_v44, %v1258_v45  ;;  %v1264_v52 = vld [vmem:[%s1986_s19 + $0x30] sm:$0xf] }
  0x35   : > { %743 = vmatpush.bf16.msra.mxu1 %v1513_v7  ;;  %1624 = vmatpush.bf16.msra.mxu3 %v1513_v7  ;;  %v1325_v51 = vor.u32 %v1489_v46, %v1322_v47  ;;  %v1476_v53 = vld [vmem:[%s1986_s19 + $0x34] sm:$0xf0]  ;;  %v1328_v54 = vld [vmem:[%s1986_s19 + $0xb0] sm:$0xf]  ;;  %v1475_v56 = vld [vmem:[%s1986_s19 + $0x34] sm:$0xf] }
  0x36   : > { %v1492_v55 = vld [vmem:[%s1986_s19 + $0xb4] sm:$0xf0]  ;;  %v1266_v57 = vld [vmem:[%s1986_s19 + $0x38] sm:$0xf0]  ;;  %v1491_v58 = vld [vmem:[%s1986_s19 + $0xb4] sm:$0xf]  ;;  %v1265_v60 = vor.u32 %v1476_v53, %v1264_v52 }
  0x37   : > { %v1330_v59 = vld [vmem:[%s1986_s19 + $0xb8] sm:$0xf0]  ;;  %v1329_v61 = vor.u32 %v1492_v55, %v1328_v54  ;;  %v1269_v62 = vor.u32 %v1475_v56, %v1266_v57  ;;  %v1272_v0 = vld [vmem:[%s1986_s19 + $0x40] sm:$0xf]  ;;  %v1478_v1 = vld [vmem:[%s1986_s19 + $0x44] sm:$0xf0] }
  0x38   : > { %655 = vmatpush.bf16.msra.mxu0 %v1504_v8  ;;  %1617 = vmatpush.bf16.msra.mxu2 %v1504_v8  ;;  %v1333_v63 = vor.u32 %v1491_v58, %v1330_v59  ;;  %v1336_v2 = vld [vmem:[%s1986_s19 + $0xc0] sm:$0xf]  ;;  %v1494_v3 = vld [vmem:[%s1986_s19 + $0xc4] sm:$0xf0]  ;;  %v1477_v4 = vld [vmem:[%s1986_s19 + $0x44] sm:$0xf]  ;;  %v1273_v8 = vor.u32 %v1478_v1, %v1272_v0 }
  0x39   : > { %744 = vmatpush.bf16.msra.mxu1 %v1512_v9  ;;  %1625 = vmatpush.bf16.msra.mxu3 %v1512_v9  ;;  %v1274_v5 = vld [vmem:[%s1986_s19 + $0x48] sm:$0xf0]  ;;  %v1493_v6 = vld [vmem:[%s1986_s19 + $0xc4] sm:$0xf]  ;;  %v1337_v9 = vor.u32 %v1494_v3, %v1336_v2  ;;  %v1479_v16 = vld [vmem:[%s1986_s19 + $0x54] sm:$0xf] }
  0x3a   : > { %v1338_v7 = vld [vmem:[%s1986_s19 + $0xc8] sm:$0xf0]  ;;  %v1282_v17 = vld [vmem:[%s1986_s19 + $0x58] sm:$0xf0]  ;;  %v1495_v18 = vld [vmem:[%s1986_s19 + $0xd4] sm:$0xf] }
  0x3b   : > { %v1346_v19 = vld [vmem:[%s1986_s19 + $0xd8] sm:$0xf0]  ;;  %v1285_v22 = vor.u32 %v1479_v16, %v1282_v17  ;;  %v1481_v28 = vld [vmem:[%s1986_s19 + $0x64] sm:$0xf]  ;;  %v1290_v29 = vld [vmem:[%s1986_s19 + $0x68] sm:$0xf0] }
  0x3c   : > { %656 = vmatpush.bf16.msra.mxu0 %v1503_v10  ;;  %1618 = vmatpush.bf16.msra.mxu2 %v1503_v10  ;;  %v1277_v10 = vor.u32 %v1477_v4, %v1274_v5  ;;  %v1349_v23 = vor.u32 %v1495_v18, %v1346_v19  ;;  %v1497_v30 = vld [vmem:[%s1986_s19 + $0xe4] sm:$0xf]  ;;  %v1354_v31 = vld [vmem:[%s1986_s19 + $0xe8] sm:$0xf0]  ;;  %v1293_v34 = vor.u32 %v1481_v28, %v1290_v29  ;;  %v1483_v40 = vld [vmem:[%s1986_s19 + $0x74] sm:$0xf] }
  0x3d   : > { %745 = vmatpush.bf16.msra.mxu1 %v1511_v11  ;;  %1626 = vmatpush.bf16.msra.mxu3 %v1511_v11  ;;  %v1341_v11 = vor.u32 %v1493_v6, %v1338_v7  ;;  %v1357_v35 = vor.u32 %v1497_v30, %v1354_v31  ;;  %v1298_v41 = vld [vmem:[%s1986_s19 + $0x78] sm:$0xf0]  ;;  %v1499_v42 = vld [vmem:[%s1986_s19 + $0xf4] sm:$0xf] }
  0x3e   : > { %v1362_v43 = vld [vmem:[%s1986_s19 + $0xf8] sm:$0xf0]  ;;  %v1301_v46 = vor.u32 %v1483_v40, %v1298_v41 }
  0x3f   : > { %v1365_v47 = vor.u32 %v1499_v42, %v1362_v43 }
  0x40   : > { %657 = vmatpush.bf16.msra.mxu0 %v1502_v12  ;;  %1619 = vmatpush.bf16.msra.mxu2 %v1502_v12  ;;  %v1280_v12 = vld [vmem:[%s1986_s19 + $0x50] sm:$0xf] }
  0x41   : > { %746 = vmatpush.bf16.msra.mxu1 %v1510_v13  ;;  %1627 = vmatpush.bf16.msra.mxu3 %v1510_v13  ;;  %v1480_v13 = vld [vmem:[%s1986_s19 + $0x54] sm:$0xf0] }
  0x42   : > { %v1281_v20 = vor.u32 %v1480_v13, %v1280_v12 }
  0x44   : > { %658 = vmatpush.bf16.msra.mxu0 %v1501_v14  ;;  %1620 = vmatpush.bf16.msra.mxu2 %v1501_v14  ;;  %v1344_v14 = vld [vmem:[%s1986_s19 + $0xd0] sm:$0xf] }
  0x45   : > { %747 = vmatpush.bf16.msra.mxu1 %v1509_v15  ;;  %1628 = vmatpush.bf16.msra.mxu3 %v1509_v15  ;;  %v1496_v15 = vld [vmem:[%s1986_s19 + $0xd4] sm:$0xf0] }
  0x46   : > { %v1345_v21 = vor.u32 %v1496_v15, %v1344_v14 }
  0x47   : > { %659 = vmatmul.bf16.vlgmr.msra.gmra.mxu0 %v1241_v24  ;;  %699 = vmatmul.bf16.vlgmr.msra.gmra.mxu2 %v1305_v25  ;;  %v1288_v24 = vld [vmem:[%s1986_s19 + $0x60] sm:$0xf]  ;;  %v1482_v25 = vld [vmem:[%s1986_s19 + $0x64] sm:$0xf0] }
  0x48   : > { %748 = vmatmul.bf16.vlgmr.msra.gmra.mxu1 %v1245_v26  ;;  %788 = vmatmul.bf16.vlgmr.msra.gmra.mxu3 %v1309_v27  ;;  %v1352_v26 = vld [vmem:[%s1986_s19 + $0xe0] sm:$0xf]  ;;  %v1498_v27 = vld [vmem:[%s1986_s19 + $0xe4] sm:$0xf0]  ;;  %v1289_v32 = vor.u32 %v1482_v25, %v1288_v24 }
  0x49   : > { %v1353_v33 = vor.u32 %v1498_v27, %v1352_v26 }
  0x57   : > { %664 = vmatmul.bf16.gmra.mxu0 %v1249_v36  ;;  %704 = vmatmul.bf16.gmra.mxu2 %v1313_v37  ;;  %v1296_v36 = vld [vmem:[%s1986_s19 + $0x70] sm:$0xf]  ;;  %v1484_v37 = vld [vmem:[%s1986_s19 + $0x74] sm:$0xf0] }
  0x58   : > { %753 = vmatmul.bf16.gmra.mxu1 %v1253_v38  ;;  %793 = vmatmul.bf16.gmra.mxu3 %v1317_v39  ;;  %v1360_v38 = vld [vmem:[%s1986_s19 + $0xf0] sm:$0xf]  ;;  %v1500_v39 = vld [vmem:[%s1986_s19 + $0xf4] sm:$0xf0]  ;;  %v1297_v44 = vor.u32 %v1484_v37, %v1296_v36 }
  0x59   : > { %v1361_v45 = vor.u32 %v1500_v39, %v1360_v38 }
  0x67   : > { %669 = vmatmul.bf16.gmra.mxu0 %v1257_v48  ;;  %709 = vmatmul.bf16.gmra.mxu2 %v1321_v49 }
  0x68   : > { %758 = vmatmul.bf16.gmra.mxu1 %v1261_v50  ;;  %798 = vmatmul.bf16.gmra.mxu3 %v1325_v51  ;;  %v2063_v51 = vld [vmem:[%s2156_s2] ss:$0 sm:$0xff] }
  0x77   : > { %674 = vmatmul.bf16.gmra.mxu0 %v1265_v60  ;;  %714 = vmatmul.bf16.gmra.mxu2 %v1329_v61 }
  0x78   : > { %763 = vmatmul.bf16.gmra.mxu1 %v1269_v62  ;;  %803 = vmatmul.bf16.gmra.mxu3 %v1333_v63 }
  0x87   : > { %679 = vmatmul.bf16.gmra.mxu0 %v1273_v8  ;;  %719 = vmatmul.bf16.gmra.mxu2 %v1337_v9 }
  0x88   : > { %768 = vmatmul.bf16.gmra.mxu1 %v1277_v10  ;;  %808 = vmatmul.bf16.gmra.mxu3 %v1341_v11 }
  0x97   : > { %684 = vmatmul.bf16.gmra.mxu0 %v1281_v20  ;;  %724 = vmatmul.bf16.gmra.mxu2 %v1345_v21 }
  0x98   : > { %773 = vmatmul.bf16.gmra.mxu1 %v1285_v22  ;;  %813 = vmatmul.bf16.gmra.mxu3 %v1349_v23 }
  0xa7   : > { %689 = vmatmul.bf16.gmra.mxu0 %v1289_v32  ;;  %729 = vmatmul.bf16.gmra.mxu2 %v1353_v33 }
  0xa8   : > { %778 = vmatmul.bf16.gmra.mxu1 %v1293_v34  ;;  %818 = vmatmul.bf16.gmra.mxu3 %v1357_v35 }
  0xb7   : > { %694 = vmatmul.bf16.gmra.mxu0 %v1297_v44  ;;  %734 = vmatmul.bf16.gmra.mxu2 %v1361_v45 }
  0xb8   : > { %783 = vmatmul.bf16.gmra.mxu1 %v1301_v46  ;;  %823 = vmatmul.bf16.gmra.mxu3 %v1365_v47 }
  0xc4   : > { %v660_v48 = vpop.f32.mrf.mxu0 }
  0xc5   : > { %v749_v49 = vpop.f32.mrf.mxu1 }
  0xc6   : > { %v750_v50 = vadd.f32 %v749_v49, %v660_v48 }
  0xc8   : > { %v932_v56 = vadd.f32 %v2063_v51, %v750_v50 }
  0xca   : > { %v700_v52 = vpop.f32.mrf.mxu2  ;;  %v1430_v60 = vclamps-f32 %v932_v56, 1.0 }
  0xcb   : > { %v789_v53 = vpop.f32.mrf.mxu3 }
  0xcc   : > { %v662_v54 = vpop.f32.mrf.mxu0  ;;  %v790_v58 = vadd.f32 %v789_v53, %v700_v52 }
  0xcd   : > { %v751_v55 = vpop.f32.mrf.mxu1 }
  0xce   : > { %v752_v57 = vadd.f32 %v751_v55, %v662_v54  ;;  %v948_v0 = vadd.f32 %v2063_v51, %v790_v58 }
  0xd0   : > { %v933_v59 = vadd.f32 %v2063_v51, %v752_v57  ;;  %v1446_v6 = vclamps-f32 %v948_v0, 1.0 }
  0xd2   : > { %v1431_v61 = vclamps-f32 %v933_v59, 1.0  ;;  %v702_v62 = vpop.f32.mrf.mxu2 }
  0xd3   : > { %v791_v63 = vpop.f32.mrf.mxu3 }
  0xd4   : > { %v1521_v1 = vpack.c.bf16 %v1431_v61, %v1430_v60  ;;  %v792_v2 = vadd.f32 %v791_v63, %v702_v62  ;;  %v665_v3 = vpop.f32.mrf.mxu0 }
  0xd5   : > { %v754_v4 = vpop.f32.mrf.mxu1 }
  0xd6   : > { %1522 = vst [vmem:[%s2069_s27] sm:$0xff] %v1521_v1   ;;  %v949_v5 = vadd.f32 %v2063_v51, %v792_v2  ;;  %v755_v9 = vadd.f32 %v754_v4, %v665_v3 }
  0xd8   : > { %v1447_v7 = vclamps-f32 %v949_v5, 1.0  ;;  %v934_v14 = vadd.f32 %v2063_v51, %v755_v9 }
  0xda   : > { %v1561_v8 = vpack.c.bf16 %v1447_v7, %v1446_v6  ;;  %v705_v10 = vpop.f32.mrf.mxu2  ;;  %v1432_v18 = vclamps-f32 %v934_v14, 1.0 }
  0xdb   : > { %v794_v11 = vpop.f32.mrf.mxu3 }
  0xdc   : > { %1605 = vst [vmem:[%s2069_s27 + $0x40] sm:$0xff] %v1561_v8   ;;  %v667_v12 = vpop.f32.mrf.mxu0  ;;  %v795_v16 = vadd.f32 %v794_v11, %v705_v10 }
  0xdd   : > { %v756_v13 = vpop.f32.mrf.mxu1 }
  0xde   : > { %v757_v15 = vadd.f32 %v756_v13, %v667_v12  ;;  %v950_v22 = vadd.f32 %v2063_v51, %v795_v16 }
  0xe0   : > { %v935_v17 = vadd.f32 %v2063_v51, %v757_v15  ;;  %v1448_v28 = vclamps-f32 %v950_v22, 1.0 }
  0xe2   : > { %v1433_v19 = vclamps-f32 %v935_v17, 1.0  ;;  %v707_v20 = vpop.f32.mrf.mxu2 }
  0xe3   : > { %v796_v21 = vpop.f32.mrf.mxu3 }
  0xe4   : > { %v1526_v23 = vpack.c.bf16 %v1433_v19, %v1432_v18  ;;  %v797_v24 = vadd.f32 %v796_v21, %v707_v20  ;;  %v670_v25 = vpop.f32.mrf.mxu0 }
  0xe5   : > { %v759_v26 = vpop.f32.mrf.mxu1 }
  0xe6   : > { %1598 = vst [vmem:[%s2069_s27 + $0x8] sm:$0xff] %v1526_v23   ;;  %v951_v27 = vadd.f32 %v2063_v51, %v797_v24  ;;  %v760_v31 = vadd.f32 %v759_v26, %v670_v25 }
  0xe8   : > { %v1449_v29 = vclamps-f32 %v951_v27, 1.0  ;;  %v936_v36 = vadd.f32 %v2063_v51, %v760_v31 }
  0xea   : > { %v1566_v30 = vpack.c.bf16 %v1449_v29, %v1448_v28  ;;  %v710_v32 = vpop.f32.mrf.mxu2  ;;  %v1434_v40 = vclamps-f32 %v936_v36, 1.0 }
  0xeb   : > { %v799_v33 = vpop.f32.mrf.mxu3 }
  0xec   : > { %1606 = vst [vmem:[%s2069_s27 + $0x48] sm:$0xff] %v1566_v30   ;;  %v672_v34 = vpop.f32.mrf.mxu0  ;;  %v800_v38 = vadd.f32 %v799_v33, %v710_v32 }
  0xed   : > { %v761_v35 = vpop.f32.mrf.mxu1 }
  0xee   : > { %v762_v37 = vadd.f32 %v761_v35, %v672_v34  ;;  %v952_v44 = vadd.f32 %v2063_v51, %v800_v38 }
  0xf0   : > { %v937_v39 = vadd.f32 %v2063_v51, %v762_v37  ;;  %v1450_v50 = vclamps-f32 %v952_v44, 1.0 }
  0xf2   : > { %v1435_v41 = vclamps-f32 %v937_v39, 1.0  ;;  %v712_v42 = vpop.f32.mrf.mxu2 }
  0xf3   : > { %v801_v43 = vpop.f32.mrf.mxu3 }
  0xf4   : > { %v1531_v45 = vpack.c.bf16 %v1435_v41, %v1434_v40  ;;  %v802_v46 = vadd.f32 %v801_v43, %v712_v42  ;;  %v675_v47 = vpop.f32.mrf.mxu0 }
  0xf5   : > { %v764_v48 = vpop.f32.mrf.mxu1 }
  0xf6   : > { %1599 = vst [vmem:[%s2069_s27 + $0x10] sm:$0xff] %v1531_v45   ;;  %v953_v49 = vadd.f32 %v2063_v51, %v802_v46  ;;  %v765_v54 = vadd.f32 %v764_v48, %v675_v47 }
  0xf8   : > { %v1451_v52 = vclamps-f32 %v953_v49, 1.0  ;;  %v938_v59 = vadd.f32 %v2063_v51, %v765_v54 }
  0xfa   : > { %v1571_v53 = vpack.c.bf16 %v1451_v52, %v1450_v50  ;;  %v715_v55 = vpop.f32.mrf.mxu2  ;;  %v1436_v63 = vclamps-f32 %v938_v59, 1.0 }
  0xfb   : > { %v804_v56 = vpop.f32.mrf.mxu3 }
  0xfc   : > { %1607 = vst [vmem:[%s2069_s27 + $0x50] sm:$0xff] %v1571_v53   ;;  %v677_v57 = vpop.f32.mrf.mxu0  ;;  %v805_v61 = vadd.f32 %v804_v56, %v715_v55 }
  0xfd   : > { %v766_v58 = vpop.f32.mrf.mxu1 }
  0xfe   : > { %v767_v60 = vadd.f32 %v766_v58, %v677_v57  ;;  %v954_v3 = vadd.f32 %v2063_v51, %v805_v61 }
 0x100   : > { %v939_v62 = vadd.f32 %v2063_v51, %v767_v60  ;;  %v1452_v9 = vclamps-f32 %v954_v3, 1.0 }
 0x102   : > { %v1437_v0 = vclamps-f32 %v939_v62, 1.0  ;;  %v717_v1 = vpop.f32.mrf.mxu2 }
 0x103   : > { %v806_v2 = vpop.f32.mrf.mxu3 }
 0x104   : > { %v1536_v4 = vpack.c.bf16 %v1437_v0, %v1436_v63  ;;  %v807_v5 = vadd.f32 %v806_v2, %v717_v1  ;;  %v680_v6 = vpop.f32.mrf.mxu0 }
 0x105   : > { %v769_v7 = vpop.f32.mrf.mxu1 }
 0x106   : > { %1600 = vst [vmem:[%s2069_s27 + $0x18] sm:$0xff] %v1536_v4   ;;  %v955_v8 = vadd.f32 %v2063_v51, %v807_v5  ;;  %v770_v12 = vadd.f32 %v769_v7, %v680_v6 }
 0x108   : > { %v1453_v10 = vclamps-f32 %v955_v8, 1.0  ;;  %v940_v17 = vadd.f32 %v2063_v51, %v770_v12 }
 0x10a   : > { %v1576_v11 = vpack.c.bf16 %v1453_v10, %v1452_v9  ;;  %v720_v13 = vpop.f32.mrf.mxu2  ;;  %v1438_v21 = vclamps-f32 %v940_v17, 1.0 }
 0x10b   : > { %v809_v14 = vpop.f32.mrf.mxu3 }
 0x10c   : > { %1608 = vst [vmem:[%s2069_s27 + $0x58] sm:$0xff] %v1576_v11   ;;  %v682_v15 = vpop.f32.mrf.mxu0  ;;  %v810_v19 = vadd.f32 %v809_v14, %v720_v13 }
 0x10d   : > { %v771_v16 = vpop.f32.mrf.mxu1 }
 0x10e   : > { %v772_v18 = vadd.f32 %v771_v16, %v682_v15  ;;  %v956_v25 = vadd.f32 %v2063_v51, %v810_v19 }
 0x110   : > { %v941_v20 = vadd.f32 %v2063_v51, %v772_v18  ;;  %v1454_v31 = vclamps-f32 %v956_v25, 1.0 }
 0x112   : > { %v1439_v22 = vclamps-f32 %v941_v20, 1.0  ;;  %v722_v23 = vpop.f32.mrf.mxu2 }
 0x113   : > { %v811_v24 = vpop.f32.mrf.mxu3 }
 0x114   : > { %v1541_v26 = vpack.c.bf16 %v1439_v22, %v1438_v21  ;;  %v812_v27 = vadd.f32 %v811_v24, %v722_v23  ;;  %v685_v28 = vpop.f32.mrf.mxu0 }
 0x115   : > { %v774_v29 = vpop.f32.mrf.mxu1 }
 0x116   : > { %1601 = vst [vmem:[%s2069_s27 + $0x20] sm:$0xff] %v1541_v26   ;;  %v957_v30 = vadd.f32 %v2063_v51, %v812_v27  ;;  %v775_v34 = vadd.f32 %v774_v29, %v685_v28 }
 0x118   : > { %v1455_v32 = vclamps-f32 %v957_v30, 1.0  ;;  %v942_v39 = vadd.f32 %v2063_v51, %v775_v34 }
 0x11a   : > { %v1581_v33 = vpack.c.bf16 %v1455_v32, %v1454_v31  ;;  %v725_v35 = vpop.f32.mrf.mxu2  ;;  %v1440_v43 = vclamps-f32 %v942_v39, 1.0 }
 0x11b   : > { %v814_v36 = vpop.f32.mrf.mxu3 }
 0x11c   : > { %1609 = vst [vmem:[%s2069_s27 + $0x60] sm:$0xff] %v1581_v33   ;;  %v687_v37 = vpop.f32.mrf.mxu0  ;;  %v815_v41 = vadd.f32 %v814_v36, %v725_v35 }
 0x11d   : > { %v776_v38 = vpop.f32.mrf.mxu1 }
 0x11e   : > { %v777_v40 = vadd.f32 %v776_v38, %v687_v37  ;;  %v958_v47 = vadd.f32 %v2063_v51, %v815_v41 }
 0x120   : > { %v943_v42 = vadd.f32 %v2063_v51, %v777_v40  ;;  %v1456_v54 = vclamps-f32 %v958_v47, 1.0 }
 0x122   : > { %v1441_v44 = vclamps-f32 %v943_v42, 1.0  ;;  %v727_v45 = vpop.f32.mrf.mxu2 }
 0x123   : > { %v816_v46 = vpop.f32.mrf.mxu3 }
 0x124   : > { %v1546_v48 = vpack.c.bf16 %v1441_v44, %v1440_v43  ;;  %v817_v49 = vadd.f32 %v816_v46, %v727_v45  ;;  %v690_v50 = vpop.f32.mrf.mxu0 }
 0x125   : > { %v779_v52 = vpop.f32.mrf.mxu1 }
 0x126   : > { %1602 = vst [vmem:[%s2069_s27 + $0x28] sm:$0xff] %v1546_v48   ;;  %v959_v53 = vadd.f32 %v2063_v51, %v817_v49  ;;  %v780_v57 = vadd.f32 %v779_v52, %v690_v50 }
 0x128   : > { %v1457_v55 = vclamps-f32 %v959_v53, 1.0  ;;  %v944_v62 = vadd.f32 %v2063_v51, %v780_v57 }
 0x12a   : > { %v1586_v56 = vpack.c.bf16 %v1457_v55, %v1456_v54  ;;  %v730_v58 = vpop.f32.mrf.mxu2  ;;  %v1442_v2 = vclamps-f32 %v944_v62, 1.0 }
 0x12b   : > { %v819_v59 = vpop.f32.mrf.mxu3 }
 0x12c   : > { %1610 = vst [vmem:[%s2069_s27 + $0x68] sm:$0xff] %v1586_v56   ;;  %v692_v60 = vpop.f32.mrf.mxu0  ;;  %v820_v0 = vadd.f32 %v819_v59, %v730_v58 }
 0x12d   : > { %v781_v61 = vpop.f32.mrf.mxu1 }
 0x12e   : > { %v782_v63 = vadd.f32 %v781_v61, %v692_v60  ;;  %v960_v6 = vadd.f32 %v2063_v51, %v820_v0 }
 0x130   : > { %v945_v1 = vadd.f32 %v2063_v51, %v782_v63  ;;  %v1458_v12 = vclamps-f32 %v960_v6, 1.0 }
 0x132   : > { %v1443_v3 = vclamps-f32 %v945_v1, 1.0  ;;  %v732_v4 = vpop.f32.mrf.mxu2 }
 0x133   : > { %v821_v5 = vpop.f32.mrf.mxu3 }
 0x134   : > { %v1551_v7 = vpack.c.bf16 %v1443_v3, %v1442_v2  ;;  %v822_v8 = vadd.f32 %v821_v5, %v732_v4  ;;  %v695_v9 = vpop.f32.mrf.mxu0 }
 0x135   : > { %v784_v10 = vpop.f32.mrf.mxu1 }
 0x136   : > { %1603 = vst [vmem:[%s2069_s27 + $0x30] sm:$0xff] %v1551_v7   ;;  %v961_v11 = vadd.f32 %v2063_v51, %v822_v8  ;;  %v785_v15 = vadd.f32 %v784_v10, %v695_v9 }
 0x138   : > { %v1459_v13 = vclamps-f32 %v961_v11, 1.0  ;;  %v946_v20 = vadd.f32 %v2063_v51, %v785_v15 }
 0x13a   : > { %v1591_v14 = vpack.c.bf16 %v1459_v13, %v1458_v12  ;;  %v735_v16 = vpop.f32.mrf.mxu2  ;;  %v1444_v24 = vclamps-f32 %v946_v20, 1.0 }
 0x13b   : > { %v824_v17 = vpop.f32.mrf.mxu3 }
 0x13c   : > { %1611 = vst [vmem:[%s2069_s27 + $0x70] sm:$0xff] %v1591_v14   ;;  %v697_v18 = vpop.f32.mrf.mxu0  ;;  %v825_v22 = vadd.f32 %v824_v17, %v735_v16 }
 0x13d   : > { %v786_v19 = vpop.f32.mrf.mxu1 }
 0x13e   : > { %v787_v21 = vadd.f32 %v786_v19, %v697_v18  ;;  %v962_v28 = vadd.f32 %v2063_v51, %v825_v22 }
 0x140   : > { %v947_v23 = vadd.f32 %v2063_v51, %v787_v21  ;;  %v1460_v32 = vclamps-f32 %v962_v28, 1.0 }
 0x142   : > { %v1445_v25 = vclamps-f32 %v947_v23, 1.0  ;;  %v737_v26 = vpop.f32.mrf.mxu2 }
 0x143   : > { %v826_v27 = vpop.f32.mrf.mxu3 }
 0x144   : > { %v1556_v29 = vpack.c.bf16 %v1445_v25, %v1444_v24  ;;  %v827_v30 = vadd.f32 %v826_v27, %v737_v26 }
 0x146   : > { %1604 = vst [vmem:[%s2069_s27 + $0x38] sm:$0xff] %v1556_v29   ;;  %v963_v31 = vadd.f32 %v2063_v51, %v827_v30 }
 0x148   : > { %v1461_v33 = vclamps-f32 %v963_v31, 1.0 }
 0x14a   : > { %v1596_v34 = vpack.c.bf16 %v1461_v33, %v1460_v32 }
 0x14c   : > { %1612 = vst [vmem:[%s2069_s27 + $0x78] sm:$0xff] %v1596_v34  }
 0x14d   : > { %1796 = shalt.err (!%p1793_p12)
}
 0x14e   : > { %s1862_s6 = smov 64   ;;  %s1863_s1 = smov 4  }
 0x14f   : > { %1635 = dma.vmem_to_hbm [thread:$0]  (%p1962_p3), %s1107_s26, 2048, %s1109_s15, %s1093_s28, %s1862_s6, %s1862_s6, %s1863_s1  }
 0x150 PF: > { %p1652_p13 = scmp.ge.s32.totalorder %s1855_s17, 2  ;;  %s1123_s20 = sand.u32 1, %s1835_s12  }
 0x151   : > { %s1124_s22 = scalar_lea.sflag [#allocation5], %s1123_s20 }
 0x152   : > { %p1646_p0 = pnand %p1652_p13, %p1933_p6 }
 0x154   : > { %p1647_p5 = pneg %p1646_p0 }
 0x156   : > { %1830 = dma.done.wait (%p1647_p5), %s1124_s22, 2048  }
 0x157   : > { %1832 = vsyncadd (%p1647_p5), %s1124_s22, 4294965248  ;;  %s20_s17 = sadd.s32 1, %s1855_s17   ;;  %s2167_s12 = smov %s1839_s13 }
 0x158   : > { %p17_p7 = scmp.ge.s32.totalorder %s20_s17, 10   ;;  %s2168_s13 = smov %s1843_s14 }
 0x159   : > { %s2169_s14 = smov %s1971_s18  ;;  %s2170_s15 = smov %s1851_s16 }
 0x15a   : > { %s2171_s16 = smov %s2173_s5  ;;  %19 = sbr.rel (!%p17_p7) target bundleno = 9 (0x9), region = 93 }
 0x15f   :  { %1130 = vsyncpa [#allocation4], 1 }
 0x160   :  { %1132 = vsyncpa [#allocation4 + $0x1], 1 }
 0x161   :  { %1133 = vsyncpa [#allocation7], 1 }
 0x162   :  { %1134 = vsyncpa [#allocation5], 1 }
 0x163   :  { %1136 = vsyncpa [#allocation5 + $0x1], 1 }

</bundles_post_ra>
